<compile_context>
chip_gen: v7x
topology: tpu7x:2x2x1
jax: 0.10.0
libtpu: 0.0.40
codegen_flags: <defaults>
</compile_context>

<pallas_src>
import jax
import jax.numpy as jnp
from jax.experimental import pallas as pl
from jax.experimental.pallas import tpu as pltpu


def _nonlocal_flash_kernel(xq_ref, th_ref, phi_ref, g_ref, wz_ref, bz_ref,
                           o_ref, m_sc, l_sc, acc_sc):
    """One (batch, q-tile, kv-tile) grid step of the embedded non-local block."""
    ki = pl.program_id(2)
    nk = pl.num_programs(2)

    # --- init per query tile: reset online-softmax state.
    @pl.when(ki == 0)
    def _init():
        m_sc[...] = jnp.full(m_sc.shape, -jnp.inf, m_sc.dtype)
        l_sc[...] = jnp.zeros(l_sc.shape, l_sc.dtype)
        acc_sc[...] = jnp.zeros(acc_sc.shape, acc_sc.dtype)

    # scores: s[k, q] = sum_ci phi^T[k, ci] * theta[ci, q]  -> (TK, TQ) f32.
    # Plain dot (LHS contracts on its last dim), both operands already bf16.
    s = jnp.dot(phi_ref[...], th_ref[...], preferred_element_type=jnp.float32)

    # --- online softmax over the key axis (axis 0), stats in f32.
    m_prev = m_sc[...]                                            # (1, TQ)
    m_new = jnp.maximum(m_prev, jnp.max(s, axis=0, keepdims=True))
    alpha = jnp.exp(m_prev - m_new)                               # (1, TQ)
    p = jnp.exp(s - m_new)                                        # (TK, TQ)
    l_sc[...] = alpha * l_sc[...] + jnp.sum(p, axis=0, keepdims=True)
    acc_sc[...] = alpha * acc_sc[...] + jnp.dot(
        g_ref[...], p.astype(jnp.bfloat16),
        preferred_element_type=jnp.float32)                       # (Ci, TQ)
    m_sc[...] = m_new

    # --- epilogue: normalize, apply (BN-folded) W_z, add residual.
    @pl.when(ki == nk - 1)
    def _finalize():
        y = acc_sc[...] * pl.reciprocal(l_sc[...], approx=True)   # (Ci, TQ)
        wy = (jnp.dot(wz_ref[...], y.astype(jnp.bfloat16),
                      preferred_element_type=jnp.float32)
              + bz_ref[...])                                      # (C, TQ)
        o_ref[...] = wy + xq_ref[...]


def _round_up(n, m):
    return ((n + m - 1) // m) * m


def _vmem_estimate(C, Cip, TQ, TK):
    """Double-buffered block footprint + persistent scratch, in bytes."""
    blocks = (C * TQ * 4        # xq residual (f32)
              + Cip * TQ * 2    # theta tile (bf16)
              + TK * Cip * 2    # phi^T tile (bf16)
              + Cip * TK * 2    # g tile (bf16)
              + C * Cip * 2     # W_z (bf16)
              + C * 4           # b_z (f32)
              + C * TQ * 4)     # output (f32)
    scratch = (Cip * TQ + 2 * TQ) * 4
    return 2 * blocks + scratch


def _pick_tile(L, C, Cip, budget_bytes=24 << 20):
    """Largest 128-multiple tile dividing L that fits a conservative VMEM budget."""
    for t in (512, 256, 128):
        if L % t == 0 and _vmem_estimate(C, Cip, t, t) <= budget_bytes:
            return t
    return L   # small / unaligned L: single full-extent tile


def nonlocal_block_1d(x_ncl, params, *, tq=None, tk=None):
    """x_ncl: (B, C, L) float32; params in PyTorch shapes. Returns (B, C, L)."""
    B, C, L = x_ncl.shape
    Ci = params["w_theta"].shape[0]
    Cip = _round_up(Ci, 16)        # zero-padding Ci is exact (see below)

    x = x_ncl.astype(jnp.float32)

    # ---- Hoisted 1x1-conv projections: once per batch, outside the kv loop.
    theta = (jnp.einsum("oc,bcl->bol", params["w_theta"], x)
             + params["b_theta"][None, :, None])                  # (B, Ci, L)
    phi_t = (jnp.einsum("oc,bcl->blo", params["w_phi"], x)
             + params["b_phi"][None, None, :])                    # (B, L, Ci)
    g = (jnp.einsum("oc,bcl->bol", params["w_g"], x)
         + params["b_g"][None, :, None])                          # (B, Ci, L)

    pad = Cip - Ci
    if pad:
        # Padded theta/phi channels are zero -> contribute 0 to every score;
        # padded g channels are zero and W_z's padded columns are zero -> the
        # output is bit-for-bit unaffected.
        theta = jnp.pad(theta, ((0, 0), (0, pad), (0, 0)))
        phi_t = jnp.pad(phi_t, ((0, 0), (0, 0), (0, pad)))
        g = jnp.pad(g, ((0, 0), (0, pad), (0, 0)))

    theta = theta.astype(jnp.bfloat16)
    phi_t = phi_t.astype(jnp.bfloat16)
    g = g.astype(jnp.bfloat16)

    # ---- Fold eval-mode BatchNorm1d into W_z.
    scale = params["bn_gamma"] * jax.lax.rsqrt(params["bn_var"] + 1e-5)   # (C,)
    wz_eff = params["w_z"] * scale[:, None]                               # (C, Ci)
    bz_eff = (params["b_z"] - params["bn_mean"]) * scale + params["bn_beta"]
    if pad:
        wz_eff = jnp.pad(wz_eff, ((0, 0), (0, pad)))
    wz = wz_eff.astype(jnp.bfloat16)                                      # (C, Cip)
    bz = bz_eff.reshape(C, 1).astype(jnp.float32)

    TQ = tq if tq is not None else _pick_tile(L, C, Cip)
    TK = tk if tk is not None else TQ
    assert L % TQ == 0 and L % TK == 0, "L must be divisible by the tiles"

    est = _vmem_estimate(C, Cip, TQ, TK)
    vmem_limit = int(min(64 << 20, max(32 << 20, 2 * est)))

    # NOTE (v7x megacore): keep B * (L // TQ) >= 2 where possible so both
    # TensorCores get parallel work.
    xq_spec = pl.BlockSpec((None, C, TQ), lambda b, qi, ki: (b, 0, qi))
    th_spec = pl.BlockSpec((None, Cip, TQ), lambda b, qi, ki: (b, 0, qi))
    phi_spec = pl.BlockSpec((None, TK, Cip), lambda b, qi, ki: (b, ki, 0))
    g_spec = pl.BlockSpec((None, Cip, TK), lambda b, qi, ki: (b, 0, ki))
    wz_spec = pl.BlockSpec((C, Cip), lambda b, qi, ki: (0, 0))
    bz_spec = pl.BlockSpec((C, 1), lambda b, qi, ki: (0, 0))
    out_spec = pl.BlockSpec((None, C, TQ), lambda b, qi, ki: (b, 0, qi))

    out = pl.pallas_call(
        _nonlocal_flash_kernel,
        out_shape=jax.ShapeDtypeStruct((B, C, L), jnp.float32),
        grid_spec=pltpu.PrefetchScalarGridSpec(
            num_scalar_prefetch=0,
            grid=(B, L // TQ, L // TK),
            in_specs=[xq_spec, th_spec, phi_spec, g_spec, wz_spec, bz_spec],
            out_specs=out_spec,
            scratch_shapes=[
                pltpu.VMEM((1, TQ), jnp.float32),     # running max  m
                pltpu.VMEM((1, TQ), jnp.float32),     # running sum  l
                pltpu.VMEM((Cip, TQ), jnp.float32),   # output accumulator
            ]),
        compiler_params=pltpu.CompilerParams(
            dimension_semantics=("parallel", "parallel", "arbitrary"),
            vmem_limit_bytes=vmem_limit),
    )(x, theta, phi_t, g, wz, bz)

    return out


def make_params(key, in_channels, inter_channels):
    """Parameter init matching the PyTorch module's shapes (Conv1d k=1)."""
    ks = jax.random.split(key, 12)
    C, Ci = in_channels, inter_channels

    def conv_init(kw, kb, out_c, in_c):
        bound = 1.0 / jnp.sqrt(in_c)
        w = jax.random.uniform(kw, (out_c, in_c), jnp.float32, -bound, bound)
        b = jax.random.uniform(kb, (out_c,), jnp.float32, -bound, bound)
        return w, b

    w_g, b_g = conv_init(ks[0], ks[1], Ci, C)
    w_th, b_th = conv_init(ks[2], ks[3], Ci, C)
    w_ph, b_ph = conv_init(ks[4], ks[5], Ci, C)
    w_z, b_z = conv_init(ks[6], ks[7], C, Ci)

    # NOTE: PyTorch zero-inits BN gamma/beta (W_z branch is a no-op at init).
    # Use nonzero BN params so the self-test exercises the attention + W_z
    # path; forward semantics are identical.
    bn_gamma = jax.random.uniform(ks[8], (C,), jnp.float32, 0.5, 1.5)
    bn_beta = 0.1 * jax.random.normal(ks[9], (C,), jnp.float32)
    bn_mean = 0.1 * jax.random.normal(ks[10], (C,), jnp.float32)
    bn_var = jax.random.uniform(ks[11], (C,), jnp.float32, 0.5, 1.5)

    return {
        "w_g": w_g, "b_g": b_g,
        "w_theta": w_th, "b_theta": b_th,
        "w_phi": w_ph, "b_phi": b_ph,
        "w_z": w_z, "b_z": b_z,
        "bn_gamma": bn_gamma, "bn_beta": bn_beta,
        "bn_mean": bn_mean, "bn_var": bn_var,
    }


def reference(x, p):
    """Pure-JAX f32 reference of the 'embedded' forward (eval-mode BN), NCL."""
    theta = jnp.einsum("oc,bcl->bol", p["w_theta"], x) + p["b_theta"][:, None]
    phi = jnp.einsum("oc,bcl->bol", p["w_phi"], x) + p["b_phi"][:, None]
    g = jnp.einsum("oc,bcl->bol", p["w_g"], x) + p["b_g"][:, None]
    f = jnp.einsum("bcl,bcm->blm", theta, phi)              # (B, L, L)
    att = jax.nn.softmax(f, axis=-1)
    y = jnp.einsum("blm,bcm->bcl", att, g)                  # (B, Ci, L)
    wy = jnp.einsum("oc,bcl->bol", p["w_z"], y) + p["b_z"][:, None]
    inv_std = jax.lax.rsqrt(p["bn_var"] + 1e-5)
    wy = ((wy - p["bn_mean"][:, None]) * (p["bn_gamma"] * inv_std)[:, None]
          + p["bn_beta"][:, None])
    return wy + x


def _run_case(key, B, C, Ci, L, tag):
    kx, kp = jax.random.split(key)
    x = jax.random.normal(kx, (B, C, L), jnp.float32)
    params = make_params(kp, C, Ci)

    z = jax.block_until_ready(nonlocal_block_1d(x, params))
    z_ref = reference(x, params)
    assert z.shape == (B, C, L)

    max_ref = float(jnp.max(jnp.abs(z_ref)))
    max_err = float(jnp.max(jnp.abs(z - z_ref)))
    # bf16 MXU operands with f32 accumulation -> tolerance scaled to output.
    tol = 5e-2 * max(1.0, max_ref)
    assert max_err < tol, f"{tag}: max abs err {max_err} (tol {tol})"


if __name__ == "__main__":
    key = jax.random.PRNGKey(0)
    k_small, k_large = jax.random.split(key)

    # Small smoke test (shapes consistent with the module defaults).
    _run_case(k_small, B=2, C=4, Ci=max(4 // 2, 1), L=16, tag="small")

    # Realistic-tiling test: exercises 128-multiple tiles, multi-step online
    # softmax over the kv axis (grid kv extent > 1), and the Ci padding path.
    _run_case(k_large, B=2, C=128, Ci=64, L=1024, tag="large")

    print("KERNEL_OK")
</pallas_src>

<mosaic_0001>
module attributes {stable_mosaic.version = 11 : i64} {
  func.func @_nonlocal_flash_kernel(%arg0: i32, %arg1: i32, %arg2: i32, %arg3: memref<1x4x16xf32, #tpu.memory_space<vmem>>, %arg4: memref<1x16x16xbf16, #tpu.memory_space<vmem>>, %arg5: memref<1x16x16xbf16, #tpu.memory_space<vmem>>, %arg6: memref<1x16x16xbf16, #tpu.memory_space<vmem>>, %arg7: memref<4x16xbf16, #tpu.memory_space<vmem>>, %arg8: memref<4x1xf32, #tpu.memory_space<vmem>>, %arg9: memref<1x4x16xf32, #tpu.memory_space<vmem>>, %arg10: memref<1x16xf32, #tpu.memory_space<vmem>>, %arg11: memref<1x16xf32, #tpu.memory_space<vmem>>, %arg12: memref<16x16xf32, #tpu.memory_space<vmem>>) attributes {dimension_semantics = [#tpu.dimension_semantics<parallel>, #tpu.dimension_semantics<parallel>, #tpu.dimension_semantics<arbitrary>], iteration_bounds = array<i64: 2, 1, 1>, scalar_prefetch = 0 : i64, scratch_operands = 3 : i64, tpu.core_type = #tpu.core_type<tc>, window_params = [{transform_indices = @transform_0, window_bounds = array<i64: 1, 4, 16>}, {transform_indices = @transform_1, window_bounds = array<i64: 1, 16, 16>}, {transform_indices = @transform_2, window_bounds = array<i64: 1, 16, 16>}, {transform_indices = @transform_3, window_bounds = array<i64: 1, 16, 16>}, {pipeline_mode = #tpu.pipeline_mode<synchronous>, transform_indices = @transform_4, window_bounds = array<i64: 4, 16>}, {pipeline_mode = #tpu.pipeline_mode<synchronous>, transform_indices = @transform_5, window_bounds = array<i64: 4, 1>}, {transform_indices = @transform_6, window_bounds = array<i64: 1, 4, 16>}]} {
    %c0_i32 = arith.constant 0 : i32
    %0 = arith.cmpi eq, %arg2, %c0_i32 : i32
    %1 = arith.extui %0 : i1 to i32
    %c0_i32_0 = arith.constant 0 : i32
    %2 = arith.cmpi ne, %1, %c0_i32_0 : i32
    scf.if %2 {
      %cst_26 = arith.constant 0xFF800000 : f32
      %36 = vector.broadcast %cst_26 : f32 to vector<1x16xf32>
      %c0_27 = arith.constant 0 : index
      %c0_28 = arith.constant 0 : index
      %37 = vector.load %arg10[%c0_27, %c0_28] : memref<1x16xf32, #tpu.memory_space<vmem>>, vector<1x16xf32>
      tpu.vector_store %arg10[%c0_27, %c0_28], %36 {strides = array<i32>} : memref<1x16xf32, #tpu.memory_space<vmem>>, vector<1x16xf32>,
      %cst_29 = arith.constant 0.000000e+00 : f32
      %38 = vector.broadcast %cst_29 : f32 to vector<1x16xf32>
      %c0_30 = arith.constant 0 : index
      %c0_31 = arith.constant 0 : index
      %39 = vector.load %arg11[%c0_30, %c0_31] : memref<1x16xf32, #tpu.memory_space<vmem>>, vector<1x16xf32>
      tpu.vector_store %arg11[%c0_30, %c0_31], %38 {strides = array<i32>} : memref<1x16xf32, #tpu.memory_space<vmem>>, vector<1x16xf32>,
      %cst_32 = arith.constant 0.000000e+00 : f32
      %40 = vector.broadcast %cst_32 : f32 to vector<16x16xf32>
      %c0_33 = arith.constant 0 : index
      %c0_34 = arith.constant 0 : index
      %41 = vector.load %arg12[%c0_33, %c0_34] : memref<16x16xf32, #tpu.memory_space<vmem>>, vector<16x16xf32>
      tpu.vector_store %arg12[%c0_33, %c0_34], %40 {strides = array<i32>} : memref<16x16xf32, #tpu.memory_space<vmem>>, vector<16x16xf32>,
    } else {
    }
    %c0 = arith.constant 0 : index
    %c0_1 = arith.constant 0 : index
    %c0_2 = arith.constant 0 : index
    %3 = vector.load %arg5[%c0, %c0_1, %c0_2] : memref<1x16x16xbf16, #tpu.memory_space<vmem>>, vector<1x16x16xbf16>
    %4 = vector.shape_cast %3 : vector<1x16x16xbf16> to vector<16x16xbf16>
    %c0_3 = arith.constant 0 : index
    %c0_4 = arith.constant 0 : index
    %c0_5 = arith.constant 0 : index
    %5 = vector.load %arg4[%c0_3, %c0_4, %c0_5] : memref<1x16x16xbf16, #tpu.memory_space<vmem>>, vector<1x16x16xbf16>
    %6 = vector.shape_cast %5 : vector<1x16x16xbf16> to vector<16x16xbf16>
    %cst = arith.constant dense<0.000000e+00> : vector<16x16xf32>
    %7 = tpu.matmul %4, %6, %cst {dimension_numbers = #tpu.dot_dimension_numbers<[1], [0], [0], [1], [0, 0, 1, 1], [], []>} : vector<16x16xbf16>, vector<16x16xbf16>, vector<16x16xf32> -> vector<16x16xf32>
    %c0_6 = arith.constant 0 : index
    %c0_7 = arith.constant 0 : index
    %8 = vector.load %arg10[%c0_6, %c0_7] : memref<1x16xf32, #tpu.memory_space<vmem>>, vector<1x16xf32>
    %cst_8 = arith.constant dense<0xFF800000> : vector<16xf32>
    %9 = vector.multi_reduction <maximumf>, %7, %cst_8 [0] : vector<16x16xf32> to vector<16xf32>
    %10 = vector.shape_cast %9 : vector<16xf32> to vector<1x16xf32>
    %11 = arith.maximumf %8, %10 : vector<1x16xf32>
    %12 = arith.subf %8, %11 : vector<1x16xf32>
    %13 = math.exp %12 : vector<1x16xf32>
    %14 = vector.broadcast %11 : vector<1x16xf32> to vector<16x16xf32>
    %15 = arith.subf %7, %14 : vector<16x16xf32>
    %16 = math.exp %15 : vector<16x16xf32>
    %c0_9 = arith.constant 0 : index
    %c0_10 = arith.constant 0 : index
    %17 = vector.load %arg11[%c0_9, %c0_10] : memref<1x16xf32, #tpu.memory_space<vmem>>, vector<1x16xf32>
    %18 = arith.mulf %13, %17 : vector<1x16xf32>
    %cst_11 = arith.constant dense<0.000000e+00> : vector<16xf32>
    %19 = vector.multi_reduction <add>, %16, %cst_11 [0] : vector<16x16xf32> to vector<16xf32>
    %20 = vector.shape_cast %19 : vector<16xf32> to vector<1x16xf32>
    %21 = arith.addf %18, %20 : vector<1x16xf32>
    %c0_12 = arith.constant 0 : index
    %c0_13 = arith.constant 0 : index
    %22 = vector.load %arg11[%c0_12, %c0_13] : memref<1x16xf32, #tpu.memory_space<vmem>>, vector<1x16xf32>
    tpu.vector_store %arg11[%c0_12, %c0_13], %21 {strides = array<i32>} : memref<1x16xf32, #tpu.memory_space<vmem>>, vector<1x16xf32>,
    %c0_14 = arith.constant 0 : index
    %c0_15 = arith.constant 0 : index
    %23 = vector.load %arg12[%c0_14, %c0_15] : memref<16x16xf32, #tpu.memory_space<vmem>>, vector<16x16xf32>
    %24 = vector.broadcast %13 : vector<1x16xf32> to vector<16x16xf32>
    %25 = arith.mulf %24, %23 : vector<16x16xf32>
    %c0_16 = arith.constant 0 : index
    %c0_17 = arith.constant 0 : index
    %c0_18 = arith.constant 0 : index
    %26 = vector.load %arg6[%c0_16, %c0_17, %c0_18] : memref<1x16x16xbf16, #tpu.memory_space<vmem>>, vector<1x16x16xbf16>
    %27 = vector.shape_cast %26 : vector<1x16x16xbf16> to vector<16x16xbf16>
    %28 = arith.truncf %16 : vector<16x16xf32> to vector<16x16xbf16>
    %cst_19 = arith.constant dense<0.000000e+00> : vector<16x16xf32>
    %29 = tpu.matmul %27, %28, %cst_19 {dimension_numbers = #tpu.dot_dimension_numbers<[1], [0], [0], [1], [0, 0, 1, 1], [], []>} : vector<16x16xbf16>, vector<16x16xbf16>, vector<16x16xf32> -> vector<16x16xf32>
    %30 = arith.addf %25, %29 : vector<16x16xf32>
    %c0_20 = arith.constant 0 : index
    %c0_21 = arith.constant 0 : index
    %31 = vector.load %arg12[%c0_20, %c0_21] : memref<16x16xf32, #tpu.memory_space<vmem>>, vector<16x16xf32>
    tpu.vector_store %arg12[%c0_20, %c0_21], %30 {strides = array<i32>} : memref<16x16xf32, #tpu.memory_space<vmem>>, vector<16x16xf32>,
    %c0_22 = arith.constant 0 : index
    %c0_23 = arith.constant 0 : index
    %32 = vector.load %arg10[%c0_22, %c0_23] : memref<1x16xf32, #tpu.memory_space<vmem>>, vector<1x16xf32>
    tpu.vector_store %arg10[%c0_22, %c0_23], %11 {strides = array<i32>} : memref<1x16xf32, #tpu.memory_space<vmem>>, vector<1x16xf32>,
    %c0_i32_24 = arith.constant 0 : i32
    %33 = arith.cmpi eq, %arg2, %c0_i32_24 : i32
    %34 = arith.extui %33 : i1 to i32
    %c0_i32_25 = arith.constant 0 : i32
    %35 = arith.cmpi ne, %34, %c0_i32_25 : i32
    scf.if %35 {
      %c0_26 = arith.constant 0 : index
      %c0_27 = arith.constant 0 : index
      %36 = vector.load %arg12[%c0_26, %c0_27] : memref<16x16xf32, #tpu.memory_space<vmem>>, vector<16x16xf32>
      %c0_28 = arith.constant 0 : index
      %c0_29 = arith.constant 0 : index
      %37 = vector.load %arg11[%c0_28, %c0_29] : memref<1x16xf32, #tpu.memory_space<vmem>>, vector<1x16xf32>
      %38 = tpu.reciprocal %37 {approx = true} : vector<1x16xf32> -> vector<1x16xf32>
      %39 = vector.broadcast %38 : vector<1x16xf32> to vector<16x16xf32>
      %40 = arith.mulf %36, %39 : vector<16x16xf32>
      %c0_30 = arith.constant 0 : index
      %c0_31 = arith.constant 0 : index
      %41 = vector.load %arg7[%c0_30, %c0_31] : memref<4x16xbf16, #tpu.memory_space<vmem>>, vector<4x16xbf16>
      %42 = arith.truncf %40 : vector<16x16xf32> to vector<16x16xbf16>
      %cst_32 = arith.constant dense<0.000000e+00> : vector<4x16xf32>
      %43 = tpu.matmul %41, %42, %cst_32 {dimension_numbers = #tpu.dot_dimension_numbers<[1], [0], [0], [1], [0, 0, 1, 1], [], []>} : vector<4x16xbf16>, vector<16x16xbf16>, vector<4x16xf32> -> vector<4x16xf32>
      %c0_33 = arith.constant 0 : index
      %c0_34 = arith.constant 0 : index
      %44 = vector.load %arg8[%c0_33, %c0_34] : memref<4x1xf32, #tpu.memory_space<vmem>>, vector<4x1xf32>
      %45 = vector.broadcast %44 : vector<4x1xf32> to vector<4x16xf32>
      %46 = arith.addf %43, %45 : vector<4x16xf32>
      %c0_35 = arith.constant 0 : index
      %c0_36 = arith.constant 0 : index
      %c0_37 = arith.constant 0 : index
      %47 = vector.load %arg3[%c0_35, %c0_36, %c0_37] : memref<1x4x16xf32, #tpu.memory_space<vmem>>, vector<1x4x16xf32>
      %48 = vector.shape_cast %47 : vector<1x4x16xf32> to vector<4x16xf32>
      %49 = arith.addf %46, %48 : vector<4x16xf32>
      %c0_38 = arith.constant 0 : index
      %c0_39 = arith.constant 0 : index
      %c0_40 = arith.constant 0 : index
      %50 = vector.load %arg9[%c0_38, %c0_39, %c0_40] : memref<1x4x16xf32, #tpu.memory_space<vmem>>, vector<1x4x16xf32>
      %51 = vector.shape_cast %50 : vector<1x4x16xf32> to vector<4x16xf32>
      %52 = vector.shape_cast %49 : vector<4x16xf32> to vector<1x4x16xf32>
      tpu.vector_store %arg9[%c0_38, %c0_39, %c0_40], %52 {strides = array<i32>} : memref<1x4x16xf32, #tpu.memory_space<vmem>>, vector<1x4x16xf32>,
    } else {
    }
    return
  }
  func.func @transform_0(%arg0: i32, %arg1: i32, %arg2: i32) -> (i32, i32, i32) {
    %c0_i32 = arith.constant 0 : i32
    %c0_i32_0 = arith.constant 0 : i32
    return %arg0, %c0_i32, %arg1 : i32, i32, i32
  }
  func.func @transform_1(%arg0: i32, %arg1: i32, %arg2: i32) -> (i32, i32, i32) {
    %c0_i32 = arith.constant 0 : i32
    %c0_i32_0 = arith.constant 0 : i32
    return %arg0, %c0_i32, %arg1 : i32, i32, i32
  }
  func.func @transform_2(%arg0: i32, %arg1: i32, %arg2: i32) -> (i32, i32, i32) {
    %c0_i32 = arith.constant 0 : i32
    %c0_i32_0 = arith.constant 0 : i32
    return %arg0, %arg2, %c0_i32 : i32, i32, i32
  }
  func.func @transform_3(%arg0: i32, %arg1: i32, %arg2: i32) -> (i32, i32, i32) {
    %c0_i32 = arith.constant 0 : i32
    %c0_i32_0 = arith.constant 0 : i32
    return %arg0, %c0_i32, %arg2 : i32, i32, i32
  }
  func.func @transform_4(%arg0: i32, %arg1: i32, %arg2: i32) -> (i32, i32) {
    %c0_i32 = arith.constant 0 : i32
    %c0_i32_0 = arith.constant 0 : i32
    %c0_i32_1 = arith.constant 0 : i32
    return %c0_i32, %c0_i32_0 : i32, i32
  }
  func.func @transform_5(%arg0: i32, %arg1: i32, %arg2: i32) -> (i32, i32) {
    %c0_i32 = arith.constant 0 : i32
    %c0_i32_0 = arith.constant 0 : i32
    %c0_i32_1 = arith.constant 0 : i32
    return %c0_i32, %c0_i32_0 : i32, i32
  }
  func.func @transform_6(%arg0: i32, %arg1: i32, %arg2: i32) -> (i32, i32, i32) {
    %c0_i32 = arith.constant 0 : i32
    %c0_i32_0 = arith.constant 0 : i32
    return %arg0, %c0_i32, %arg1 : i32, i32, i32
  }
}

</mosaic_0001>

<bundles_post_ra>
// kernel: tpu_custom_call.1
= control target key start
LH: loop header
LB: loop body
LE: loop exit
PB: predicated region body
PF: predicated region fallthrough
CT: control target
= control target key end

     0   :  { %s1485_s0 = inlined_call_operand.hbm [shape: f32[2,4,16], index: 0, kind: input, shape index: {}]   ;;  %s1486_s1 = inlined_call_operand.hbm [shape: bf16[2,16,16], index: 1, kind: input, shape index: {}]   ;;  %s1487_s2 = inlined_call_operand.hbm [shape: bf16[2,16,16], index: 2, kind: input, shape index: {}]   ;;  %s1488_s3 = inlined_call_operand.vmem [shape: bf16[2,16,16], index: 3, kind: input, shape index: {}]   ;;  %s1489_s4 = inlined_call_operand.vmem [shape: bf16[4,16], index: 4, kind: input, shape index: {}]   ;;  %s1490_s5 = inlined_call_operand.vmem [shape: f32[4,1], index: 5, kind: input, shape index: {}]   ;;  %s1491_s6 = inlined_call_operand.hbm [shape: f32[2,4,16], index: 6, kind: output, shape index: {}]  }
   0x1   :  { %1504 = sst [smem:[#allocation20_spill]] %s1486_s1 }
   0x2   :  { %1505 = sst [smem:[#allocation21_spill]] %s1491_s6 }
   0x3   :  { %11 = vsyncpa [#allocation6], 0 }
   0x4   :  { %13 = vsyncpa [#allocation6 + $0x1], 0 }
   0x5   :  { %14 = vsyncpa [#allocation9], 0 }
   0x6   :  { %16 = vsyncpa [#allocation9 + $0x1], 0 }
   0x7   :  { %17 = vsyncpa [#allocation7], 0 }
   0x8   :  { %19 = vsyncpa [#allocation7 + $0x1], 0  ;;  %s1188_s21 = smov 0   ;;  %s1190_s22 = smov 0  }
   0x9   :  { %s1192_s23 = smov 0   ;;  %s1194_s24 = smov 0  }
   0xa   :  { %s1196_s25 = smov 0   ;;  %s1198_s26 = smov 0  }
   0xb LB: > { %1506 = sst [smem:[#allocation15_spill]] %s1121_s21  ;;  %s1219_s27 = sadd.s32 4294967295, %s1141_s26   ;;  %s1141_s26 = sphi %s1198_s26, %s25_s26   ;;  %s1137_s25 = sphi %s1196_s25, %s1537_s25   ;;  %s1133_s24 = sphi %s1194_s24, %s1536_s24   ;;  %s1129_s23 = sphi %s1192_s23, %s1532_s23   ;;  %s1125_s22 = sphi %s1190_s22, %s1535_s22   ;;  %s1121_s21 = sphi %s1188_s21, %s1534_s21  }
   0xc   : > { %1507 = sst [smem:[#allocation16_spill]] %s1129_s23  ;;  %s820_s28 = sadd.s32 4294967294, %s1141_s26  }
   0xd   : > { %s44_s29 = sadd.s32 1, %s1137_s25  ;;  %s53_s30 = sadd.s32 1, %s1129_s23 }
   0xe   : > { %p46_p0 = scmp.ge.s32.totalorder %s44_s29, 2  ;;  %p60_p1 = scmp.ne.s32.totalorder %s1129_s23, %s1125_s22 }
   0xf   : > { %p61_p2 = scmp.eq.s32.totalorder %s1141_s26, 0  ;;  %p66_p3 = scmp.ne.s32.totalorder %s1125_s22, %s1121_s21 }
  0x10   : > { %s1539_s29 = smov (%p46_p0, %s44_s29), 0  ;;  %p67_p5 = scmp.eq.s32.totalorder %s1219_s27, 0 }
  0x11   : > { %1508 = sst [smem:[#allocation17_spill]] %s1539_s29  ;;  %p1231_p4 = por %p61_p2, %p60_p1 }
  0x12   : > { %s48_s8 = ssub.s32 %s1137_s25, %s1539_s29  ;;  %p218_p6 = scmp.eq.s32.totalorder %s1219_s27, 1 }
  0x13   : > { %p51_p7 = scmp.eq.s32.totalorder %s48_s8, 0  ;;  %p1239_p8 = por %p67_p5, %p66_p3 }
  0x14   : > { %p1243_p9 = por %p218_p6, %p60_p1  ;;  %p224_p10 = scmp.eq.s32.totalorder %s820_s28, 1 }
  0x15   : > { %s1510_s9 = scalar_select %p1239_p8, 1, 0 }
  0x16   : > { %s1511_s10 = scalar_select %p1243_p9, 1, 0 }
  0x17   : > { %s1248_s11 = scalar_select %p51_p7, %s1129_s23, %s53_s30  }
  0x18   : > { %p1250_p11 = por %p224_p10, %p66_p3  ;;  %p897_p13 = scmp.lt.s32.totalorder %s1141_s26, 2 }
  0x19   : > { %1512 = sst [smem:[#allocation18_spill]] %s1248_s11  ;;  %s1257_s13 = sand.u32 1, %s1129_s23  }
  0x1a   : > { %s1513_s12 = scalar_select %p1250_p11, 1, 0 }
  0x1b   : > { %s269_s14 = sand.u32 1, %s1141_s26   ;;  %s1493_s15 = sshll.u32 %s1257_s13, 3 }
  0x1c   : > { %1514 = sst [smem:[#allocation19_spill]] %s1513_s12  ;;  %p1263_p0 = pnand %p897_p13, %p1231_p4 }
  0x1d   : > { %s1494_s17 = sshll.u32 %s1137_s25, 7  ;;  %s1516_s1 = sld [smem:[#allocation20_spill]] }
  0x1e   : > { %s1515_s16 = scalar_select %p1263_p0, 1, 0 }
  0x1f   : > { %s273_s28 = scalar_lea.vmem [#allocation8], %s1493_s15  ;;  %s1279_s7 = scalar_lea.sflag [#allocation9], %s269_s14 }
  0x20   : > { %s281_s30 = sshll.u32 %s273_s28, 4  ;;  %p1285_p2 = pneg %p1263_p0  ;;  %s1277_s30 = int_to_ptr.vmem [resolvable:$true] %s281_s30 }
  0x23   : > { %s1273_s20 = scalar_lea.hbm %s1516_s1, %s1494_s17  ;;  %s970_s15 = scalar_lea.hbm %s1516_s1, 256 }
  0x24   : > { %s965_s8 = scalar_lea.hbm %s1273_s20, 128  ;;  %p971_p5 = scmp.lt.u32.totalorder %s1273_s20, %s1516_s1 }
  0x25   : > { %p966_p1 = scmp.ne.s32.totalorder %s1273_s20, %s965_s8  ;;  %p972_p6 = scmp.lt.u32.totalorder %s970_s15, %s965_s8 }
  0x26   : > { %p974_p10 = scmp.lt.u32.totalorder %s965_s8, %s1273_s20 }
  0x27   : > { %p968_p3 = pnand %p1285_p2, %p966_p1  ;;  %p973_p7 = por %p972_p6, %p971_p5 }
  0x29   : > { %p969_p4 = pneg %p968_p3  ;;  %p975_p13 = por %p974_p10, %p973_p7 }
  0x2b   : > { %p976_p12 = pnand %p975_p13, %p969_p4 }
  0x2d   : > { %979 = shalt.err (!%p976_p12)
}
  0x2e   : > { %s980_s14 = scalar_lea.vmem %s1277_s30, 128  ;;  %s1143_s18 = smov [#allocation8]  }
  0x2f   : > { %p981_p1 = scmp.ne.s32.totalorder %s1277_s30, %s980_s14  ;;  %s985_s19 = sshll.u32 %s1143_s18, 4  ;;  %s986_s19 = int_to_ptr.vmem [resolvable:$false] %s985_s19 }
  0x30   : > { %s987_s17 = scalar_lea.vmem %s986_s19, 256  ;;  %p988_p9 = scmp.lt.s32.totalorder %s1277_s30, %s986_s19 }
  0x31   : > { %p983_p3 = pnand %p981_p1, %p1285_p2  ;;  %p989_p8 = scmp.lt.s32.totalorder %s987_s17, %s980_s14 }
  0x33   : > { %p984_p11 = pneg %p983_p3  ;;  %p990_p5 = por %p989_p8, %p988_p9 }
  0x35   : > { %p991_p6 = pnand %p990_p5, %p984_p11 }
  0x37   : > { %994 = shalt.err (!%p991_p6)
}
  0x38   : > { %s1501_s15 = smov 64   ;;  %s1145_s8 = smov 4  }
  0x39   : > { %889 = dma.hbm_to_vmem [thread:$0]  (!%p1263_p0), %s1273_s20, 128, %s1277_s30, %s1279_s7, %s1501_s15, %s1501_s15, %s1145_s8  }
  0x3a   : > { %s1518_s28 = sshll.u32 %s1137_s25, 7  ;;  %p831_p8 = scmp.ge.s32.totalorder %s1141_s26, 1 }
  0x3b   : > { %s1317_s19 = scalar_lea.hbm %s1487_s2, %s1518_s28  ;;  %s1519_s17 = sshll.u32 %s1257_s13, 3 }
  0x3c   : > { %s295_s1 = scalar_lea.vmem [#allocation10], %s1519_s17  ;;  %p323_p9 = scmp.lt.s32.totalorder %s1141_s26, 3 }
  0x3d   : > { %s304_s11 = sshll.u32 %s295_s1, 4  ;;  %s823_s12 = sshll.u32 %s1257_s13, 2  ;;  %s1334_s11 = int_to_ptr.vmem [resolvable:$true] %s304_s11 }
  0x3e   : > { %p1323_p11 = pnand %p831_p8, %p323_p9  ;;  %s824_s21 = sshll.u32 %s1137_s25, 6 }
  0x3f   : > { %s1332_s30 = scalar_lea.hbm %s1485_s0, %s824_s21  ;;  %s254_s28 = scalar_lea.vmem [#allocation5], %s823_s12 }
  0x40   : > { %s1520_s23 = scalar_select %p1323_p11, 1, 0 }
  0x41   : > { %s262_s1 = sshll.u32 %s254_s28, 4  ;;  %s251_s14 = scalar_lea.sflag [#allocation6], %s1257_s13  ;;  %s263_s1 = int_to_ptr.vmem [resolvable:$true] %s262_s1 }
  0x42   : > { %s995_s18 = scalar_lea.hbm %s1332_s30, 64  ;;  %s1000_s6 = scalar_lea.hbm %s1485_s0, 128 }
  0x43   : > { %p996_p12 = scmp.ne.s32.totalorder %s1332_s30, %s995_s18  ;;  %p1001_p10 = scmp.lt.u32.totalorder %s1332_s30, %s1485_s0 }
  0x44   : > { %p1002_p13 = scmp.lt.u32.totalorder %s1000_s6, %s995_s18  ;;  %p1004_p3 = scmp.lt.u32.totalorder %s995_s18, %s1332_s30 }
  0x45   : > { %p998_p4 = pnand %p996_p12, %p1285_p2 }
  0x46   : > { %p1003_p1 = por %p1002_p13, %p1001_p10 }
  0x47   : > { %p999_p7 = pneg %p998_p4 }
  0x48   : > { %p1005_p5 = por %p1004_p3, %p1003_p1 }
  0x4a   : > { %p1006_p6 = pnand %p1005_p5, %p999_p7 }
  0x4c   : > { %1009 = shalt.err (!%p1006_p6)
}
  0x4d   : > { %s1010_s12 = scalar_lea.vmem %s263_s1, 64  ;;  %s1146_s13 = smov [#allocation5]  }
  0x4e   : > { %p1011_p8 = scmp.ne.s32.totalorder %s263_s1, %s1010_s12  ;;  %s1015_s28 = sshll.u32 %s1146_s13, 4  ;;  %s1016_s28 = int_to_ptr.vmem [resolvable:$false] %s1015_s28 }
  0x4f   : > { %s1017_s15 = scalar_lea.vmem %s1016_s28, 128  ;;  %p1018_p4 = scmp.lt.s32.totalorder %s263_s1, %s1016_s28 }
  0x50   : > { %p1013_p9 = pnand %p1011_p8, %p1285_p2  ;;  %p1019_p11 = scmp.lt.s32.totalorder %s1017_s15, %s1010_s12 }
  0x52   : > { %p1014_p12 = pneg %p1013_p9  ;;  %p1020_p0 = por %p1019_p11, %p1018_p4 }
  0x54   : > { %p1021_p10 = pnand %p1020_p0, %p1014_p12 }
  0x56   : > { %1024 = shalt.err (!%p1021_p10)
}
  0x57   : > { %p1521_p13 = scmp.ne.s32.totalorder %s1515_s16, 0  ;;  %s1025_s18 = scalar_lea.hbm %s1317_s19, 128 }
  0x58   : > { %p1026_p7 = scmp.ne.s32.totalorder %s1317_s19, %s1025_s18  ;;  %s1030_s21 = scalar_lea.hbm %s1487_s2, 256 }
  0x59   : > { %886 = dma.hbm_to_vmem [thread:$0]  (!%p1521_p13), %s1332_s30, 64, %s263_s1, %s251_s14  }
  0x5a   : > { %p1028_p1 = pnand %p1026_p7, %p1285_p2  ;;  %p1031_p0 = scmp.lt.u32.totalorder %s1317_s19, %s1487_s2 }
  0x5b   : > { %p1032_p11 = scmp.lt.u32.totalorder %s1030_s21, %s1025_s18  ;;  %p1034_p6 = scmp.lt.u32.totalorder %s1025_s18, %s1317_s19 }
  0x5c   : > { %p1029_p3 = pneg %p1028_p1 }
  0x5d   : > { %p1033_p5 = por %p1032_p11, %p1031_p0 }
  0x5f   : > { %p1035_p8 = por %p1034_p6, %p1033_p5 }
  0x61   : > { %p1036_p9 = pnand %p1035_p8, %p1029_p3 }
  0x63   : > { %1039 = shalt.err (!%p1036_p9)
}
  0x64   : > { %s1040_s30 = scalar_lea.vmem %s1334_s11, 128  ;;  %s1147_s1 = smov [#allocation10]  }
  0x65   : > { %p1041_p12 = scmp.ne.s32.totalorder %s1334_s11, %s1040_s30  ;;  %s1045_s14 = sshll.u32 %s1147_s1, 4  ;;  %s1046_s14 = int_to_ptr.vmem [resolvable:$false] %s1045_s14 }
  0x66   : > { %s1047_s13 = scalar_lea.vmem %s1046_s14, 256  ;;  %p1048_p7 = scmp.lt.s32.totalorder %s1334_s11, %s1046_s14 }
  0x67   : > { %p1043_p4 = pnand %p1041_p12, %p1285_p2  ;;  %p1049_p1 = scmp.lt.s32.totalorder %s1047_s13, %s1040_s30 }
  0x69   : > { %p1044_p10 = pneg %p1043_p4  ;;  %p1050_p0 = por %p1049_p1, %p1048_p7 }
  0x6b   : > { %p1051_p11 = pnand %p1050_p0, %p1044_p10 }
  0x6d   : > { %1054 = shalt.err (!%p1051_p11)
}
  0x6e   : > { %s1522_s28 = smov 64   ;;  %p1523_p2 = scmp.ne.s32.totalorder %s1520_s23, 0 }
  0x6f   : > { %892 = dma.hbm_to_vmem [thread:$0]  (!%p1521_p13), %s1317_s19, 128, %s1334_s11, %s1279_s7, %s1522_s28, %s1522_s28, %s1145_s8  }
  0x70   : > { %327 = sbr.rel (%p1523_p2) target bundleno = 844 (0x34c), region = 44  ;;  %s1382_s29 = sand.u32 (!%p1523_p2), 1, %s1125_s22  }
  0x71   : > { %s832_s15 = sshll.u32 (!%p1523_p2), %s1382_s29, 2  ;;  %s330_s18 = scalar_lea.sflag (!%p1523_p2), [#allocation6], %s1382_s29 }
  0x72   : > { %s1388_s16 = scalar_lea.vmem (!%p1523_p2), [#allocation5], %s832_s15  ;;  %p1524_p3 = scmp.ne.s32.totalorder (!%p1523_p2), %s1510_s9, 0 }
  0x77   : > { %1108 = dma.done.wait (%p1524_p3), %s330_s18, 64  }
  0x78   : > { %1110 = vsyncadd (%p1524_p3), %s330_s18, 4294967232  ;;  %s338_s23 = sand.u32 1, %s1219_s27   ;;  %s833_s11 = sshll.u32 %s1382_s29, 3 }
  0x79   : > { %s339_s7 = scalar_lea.sflag [#allocation9], %s338_s23  ;;  %s342_s8 = scalar_lea.vmem [#allocation8], %s833_s11 }
  0x7a   : > { %1112 = dma.done.wait (%p1524_p3), %s339_s7, 256  }
  0x7b   : > { %1114 = vsyncadd (%p1524_p3), %s339_s7, 4294967040  ;;  %vm415_vm0 = vcmask 130048   ;;  %v1148_v0 = vmov 0.0   ;;  %vm1149_vm1 = vmmov 0   ;;  %v954_v1 = vld [vmem:[%s342_s8] sm:$0xff]   ;;  %s351_s27 = scalar_lea.vmem [#allocation10], %s833_s11  ;;  %v493_v13 = vlaneseq }
  0x7c   : > { %857 = vmatprep.subr.bf16.mxu0 %v1148_v0  ;;  %859 = vmatprep.mubr.msk.bf16.mxu0 %vm1149_vm1, %v1148_v0  ;;  %416 = vst.msk [vmem:[#allocation4] sm:$0xff] %vm415_vm0, %v1148_v0  ;;  %417 = vst.msk [vmem:[#allocation4 + $0x8] sm:$0xff] %vm415_vm0, %v1148_v0  ;;  %v955_v2 = vld [vmem:[%s351_s27] sm:$0xff]   ;;  %vm412_vm2 = vcmask 122880   ;;  %v1150_v3 = vmov -inf   ;;  %p399_p13 = scmp.lt.s32.totalorder %s1133_s24, 1 }
  0x7d   : > { %863 = vmatprep.subr.bf16.mxu1 %v1148_v0  ;;  %865 = vmatprep.mubr.msk.bf16.mxu1 %vm1149_vm1, %v1148_v0  ;;  %413 = vst.msk [vmem:[#allocation2] sm:$0x1] %vm412_vm2, %v1150_v3  ;;  %414 = vst.msk [vmem:[#allocation3] sm:$0x1] %vm412_vm2, %v1148_v0  ;;  %v494_v16 = vshrl.u32 %v493_v13, 7  ;;  %v1151_v48 = vmov 0  }
  0x7e   : > { %858 = vmatpush3.bf16.msra.mxu0 %v954_v1  ;;  %s400_s9 = scalar_select %p399_p13, %s1133_s24, 1  ;;  %v602_v47 = vld [vmem:[%s1490_s5] sm:$0xf]  ;;  %953 = vset.pattern.permute.xlu0 %v1151_v48  ;;  %vm653_vm3 = vcmask 125952  }
  0x7f   : > { %869 = vmatprep.subr.bf16.mxu0 %v1148_v0  ;;  %v495_v20 = vsub.s32 0, %v494_v16  ;;  %605 = vperm.xlu0 %953, %v602_v47   ;;  %v600_v3 = vld [vmem:[%s1489_s4] sm:$0x3]  ;;  %s845_s14 = sshll.u32 %s1133_s24, 6  ;;  %s397_s13 = scalar_lea.vmem [#allocation11], %s832_s15 }
  0x80   : > { %s850_s19 = sshll.u32 %s400_s9, 3  ;;  %s670_s28 = sshll.u32 %s397_s13, 4  ;;  %s1438_s28 = int_to_ptr.vmem [resolvable:$true] %s670_s28 }
  0x81   : > { %860 = vmatmul.mubr.msk.bf16.vlgmr.msra.gmra.mrb[0].mxu0 %vm415_vm0, %v955_v2  ;;  %s1410_s21 = scalar_lea.vmem %s1488_s3, %s850_s19  ;;  %s1525_s11 = sld [smem:[#allocation21_spill]] }
  0x82   : > { %871 = vmatprep.mubr.msk.bf16.mxu0 %vm1149_vm1, %v1148_v0  ;;  %v956_v37 = vld [vmem:[%s1410_s21] sm:$0xff]   ;;  %s656_s24 = scalar_lea.sflag [#allocation7], %s1382_s29  ;;  %s1055_s15 = scalar_lea.vmem %s1438_s28, 64 }
  0x83   : > { %v518_v50 = vld [vmem:[#allocation4] sm:$0xff]  ;;  %v519_v51 = vld [vmem:[#allocation4 + $0x8] sm:$0xff]  ;;  %p1056_p5 = scmp.ne.s32.totalorder %s1438_s28, %s1055_s15  ;;  %p1526_p6 = scmp.ne.s32.totalorder %s1511_s10, 0 }
  0x84   : > { %v478_v18 = vld [vmem:[#allocation2] sm:$0x1]  ;;  %v504_v42 = vld [vmem:[#allocation3] sm:$0x1] }
  0x85   : > { %p1057_p8 = pnand %p1056_p5, %p1526_p6 }
  0x87   : > { %s1436_s7 = scalar_lea.hbm %s1525_s11, %s845_s14  ;;  %p1058_p9 = pneg %p1057_p8 }
 0x154   : > { %v471_v4 = vpop.f32.mrb[0].mxu0 }
 0x155   : > { %v861_v5 = vpop.f32.mrb[1].mxu0  ;;  %v479_v7 = vsel %vm415_vm0, %v471_v4, -inf }
 0x156   : > { %v474_v6 = vpop.f32.mrb[2].mxu0 }
 0x157   : > { %v480_v8 = vsel %vm415_vm0, %v474_v6, -inf  ;;  %v862_v9 = vpop.f32.mrb[3].mxu0 }
 0x158   : > { %v481_v10 = vmax.f32 %v479_v7, %v480_v8 }
 0x15a   : > { %v482_v11 = vrot.slane %v481_v10, 4 }
 0x15c   : > { %v483_v12 = vmax.f32 %v481_v10, %v482_v11 }
 0x15e   : > { %v484_v14 = vrot.slane %v483_v12, 2 }
 0x160   : > { %v485_v15 = vmax.f32 %v483_v12, %v484_v14 }
 0x162   : > { %v486_v17 = vrot.slane %v485_v15, 1 }
 0x164   : > { %v487_v19 = vmax.f32 %v485_v15, %v486_v17 }
 0x166   : > { %v488_v21 = vmax.f32 %v478_v18, %v487_v19 }
 0x168   : > { %v489_v22 = vsub.f32 %v478_v18, %v488_v21  ;;  %v496_v23 = vrot.slane %v488_v21, %v495_v20  ;;  %584 = vst.msk [vmem:[#allocation2] sm:$0x1] %vm412_vm2, %v488_v21 }
 0x16a   : > { %v490_v24 = vmul.f32 1.442695, %v489_v22  ;;  %v498_v25 = vsub.f32 %v471_v4, %v496_v23  ;;  %v499_v26 = vsub.f32 %v474_v6, %v496_v23  ;;  %v606_v4 = vpop.permute.xlu0 %605  ;;  %v651_v6 = vld [vmem:[%s1388_s16] sm:$0xf]  ;;  %s1152_s16 = smov [#allocation11]  }
 0x16b   : > { %s1059_s8 = sshll.u32 %s1152_s16, 4  ;;  %s1060_s8 = int_to_ptr.vmem [resolvable:$false] %s1059_s8 }
 0x16c   : > { %957 = vpow2.f32 %v490_v24  ;;  %v500_v27 = vmul.f32 1.442695, %v498_v25  ;;  %v502_v28 = vmul.f32 1.442695, %v499_v26  ;;  %s1061_s27 = scalar_lea.vmem %s1060_s8, 128  ;;  %p1062_p12 = scmp.lt.s32.totalorder %s1438_s28, %s1060_s8 }
 0x16d   : > { %p1063_p4 = scmp.lt.s32.totalorder %s1061_s27, %s1055_s15 }
 0x16e   : > { %959 = vpow2.f32 %v500_v27 }
 0x16f   : > { %961 = vpow2.f32 %v502_v28  ;;  %p1064_p10 = por %p1063_p4, %p1062_p12 }
 0x171   : > { %p1065_p7 = pnand %p1064_p10, %p1058_p9 }
 0x176   : > { %v958_v29 = vpop.eup %957 }
 0x177   : > { %v524_v30 = vrot.slane %v958_v29, %v495_v20  ;;  %v505_v44 = vmul.f32 %v958_v29, %v504_v42 }
 0x178   : > { %v960_v31 = vpop.eup %959 }
 0x179   : > { %v962_v32 = vpop.eup %961  ;;  %v506_v33 = vsel %vm415_vm0, %v960_v31, 0.0  ;;  %v526_v52 = vmul.f32 %v524_v30, %v518_v50  ;;  %v527_v56 = vmul.f32 %v524_v30, %v519_v51 }
 0x17a   : > { %v507_v34 = vsel %vm415_vm0, %v962_v32, 0.0  ;;  %v530_v35 = vpack.c.bf16 %v962_v32, %v960_v31 }
 0x17b   : > { %v508_v36 = vadd.f32 %v507_v34, %v506_v33 }
 0x17c   : > { %864 = vmatpush3.bf16.msra.mxu1 %v530_v35 }
 0x17d   : > { %v509_v38 = vrot.slane %v508_v36, 4 }
 0x17f   : > { %v510_v39 = vadd.f32 %v509_v38, %v508_v36  ;;  %866 = vmatmul.mubr.msk.bf16.vlgmr.msra.gmra.mrb[0].mxu1 %vm415_vm0, %v956_v37 }
 0x181   : > { %v511_v40 = vrot.slane %v510_v39, 2 }
 0x183   : > { %v512_v41 = vadd.f32 %v511_v40, %v510_v39 }
 0x185   : > { %v513_v43 = vrot.slane %v512_v41, 1 }
 0x187   : > { %v514_v45 = vadd.f32 %v513_v43, %v512_v41 }
 0x189   : > { %v515_v46 = vadd.f32 %v514_v45, %v505_v44 }
 0x18b   : > { %517 = vst.msk [vmem:[#allocation3] sm:$0x1] %vm412_vm2, %v515_v46 }
 0x192   : > { %v590_v49 = vld [vmem:[#allocation3] sm:$0x1] }
 0x193   : > { %963 = vrcp.f32 %v590_v49 }
 0x19d   : > { %v964_v60 = vpop.eup %963 }
 0x19e   : > { %v596_v62 = vrot.slane %v964_v60, %v495_v20 }
 0x252   : > { %v573_v53 = vpop.f32.mrb[0].mxu1 }
 0x253   : > { %v580_v54 = vadd.f32 %v573_v53, %v526_v52  ;;  %v867_v55 = vpop.f32.mrb[1].mxu1 }
 0x254   : > { %v576_v57 = vpop.f32.mrb[2].mxu1 }
 0x255   : > { %582 = vst.msk [vmem:[#allocation4] sm:$0xff] %vm415_vm0, %v580_v54  ;;  %v581_v58 = vadd.f32 %v576_v57, %v527_v56  ;;  %v868_v59 = vpop.f32.mrb[3].mxu1 }
 0x257   : > { %583 = vst.msk [vmem:[#allocation4 + $0x8] sm:$0xff] %vm415_vm0, %v581_v58 }
 0x25c   : > { %v588_v61 = vld [vmem:[#allocation4] sm:$0xff] }
 0x25d   : > { %v598_v0 = vmul.f32 %v596_v62, %v588_v61 }
 0x25e   : > { %v589_v63 = vld [vmem:[#allocation4 + $0x8] sm:$0xff] }
 0x25f   : > { %v599_v1 = vmul.f32 %v596_v62, %v589_v63 }
 0x261   : > { %v601_v2 = vpack.c.bf16 %v599_v1, %v598_v0 }
 0x263   : > { %870 = vmatpush3.bf16.msra.mxu0 %v601_v2 }
 0x266   : > { %872 = vmatmul.mubr.msk.bf16.vlgmr.msra.gmra.mrb[4].mxu0 %vm415_vm0, %v600_v3 }
 0x339   : > { %v645_v5 = vpop.f32.mrb[4].mxu0 }
 0x33a   : > { %v873_v7 = vpop.f32.mrb[5].mxu0  ;;  %v646_v8 = vadd.f32 %v645_v5, %v606_v4 }
 0x33b   : > { %v648_v9 = vpop.f32.mrb[6].mxu0 }
 0x33c   : > { %v652_v10 = vadd.f32 %v651_v6, %v646_v8  ;;  %v874_v11 = vpop.f32.mrb[7].mxu0 }
 0x33e   : > { %654 = vst.msk [vmem:[%s397_s13] sm:$0xf] %vm653_vm3, %v652_v10 }
 0x33f   : > { %1068 = shalt.err (!%p1065_p7)
}
 0x340   : > { %s1069_s29 = scalar_lea.hbm %s1436_s7, 64  ;;  %s1073_s17 = scalar_lea.hbm %s1525_s11, 128 }
 0x341   : > { %p1070_p1 = scmp.ne.s32.totalorder %s1436_s7, %s1069_s29  ;;  %p1074_p2 = scmp.lt.u32.totalorder %s1436_s7, %s1525_s11 }
 0x342   : > { %p1075_p3 = scmp.lt.u32.totalorder %s1073_s17, %s1069_s29  ;;  %p1077_p5 = scmp.lt.u32.totalorder %s1069_s29, %s1436_s7 }
 0x343   : > { %p1071_p0 = pnand %p1070_p1, %p1526_p6 }
 0x344   : > { %p1076_p13 = por %p1075_p3, %p1074_p2 }
 0x345   : > { %p1072_p11 = pneg %p1071_p0 }
 0x346   : > { %p1078_p8 = por %p1077_p5, %p1076_p13 }
 0x348   : > { %p1079_p9 = pnand %p1078_p8, %p1072_p11 }
 0x34a   : > { %1082 = shalt.err (!%p1079_p9)
}
 0x34b   : > { %881 = dma.vmem_to_hbm [thread:$0]  (%p1526_p6), %s1438_s28, 64, %s1436_s7, %s656_s24  }
 0x34c PF: > { %s1527_s20 = sld [smem:[#allocation15_spill]]  ;;  %s1528_s12 = sld [smem:[#allocation19_spill]] }
 0x34d   : > { %p1530_p4 = scmp.ge.s32.totalorder %s1141_s26, 2 }
 0x352   : > { %s682_s30 = sand.u32 1, %s1527_s20   ;;  %p1529_p12 = scmp.ne.s32.totalorder %s1528_s12, 0 }
 0x353   : > { %s683_s1 = scalar_lea.sflag [#allocation7], %s682_s30 }
 0x354   : > { %p894_p10 = pnand %p1530_p4, %p1529_p12 }
 0x356   : > { %1116 = dma.done.wait (!%p894_p10), %s683_s1, 64  }
 0x357   : > { %1118 = vsyncadd (!%p894_p10), %s683_s1, 4294967232  ;;  %s25_s26 = sadd.s32 1, %s1141_s26   ;;  %s1531_s14 = sld [smem:[#allocation16_spill]] }
 0x358   : > { %p22_p7 = scmp.ge.s32.totalorder %s25_s26, 4   ;;  %s1532_s23 = sld [smem:[#allocation18_spill]] }
 0x359   : > { %s1533_s10 = sld [smem:[#allocation17_spill]]  ;;  %s1534_s21 = smov %s1125_s22 }
 0x35a   : > { %s1536_s24 = smov %s1137_s25  ;;  %24 = sbr.rel (!%p22_p7) target bundleno = 11 (0xb), region = 124 }
 0x35d   : > { %s1535_s22 = smov %s1531_s14 }
 0x35f   : > { %s1537_s25 = smov %s1533_s10 }
 0x361   :  { %688 = vsyncpa [#allocation6], 1 }
 0x362   :  { %690 = vsyncpa [#allocation6 + $0x1], 1 }
 0x363   :  { %691 = vsyncpa [#allocation9], 1 }
 0x364   :  { %693 = vsyncpa [#allocation9 + $0x1], 1 }
 0x365   :  { %694 = vsyncpa [#allocation7], 1 }
 0x366   :  { %696 = vsyncpa [#allocation7 + $0x1], 1 }

</bundles_post_ra>
